<compile_context>
chip_gen: v7x
topology: tpu7x:2x2x1
jax: 0.10.0
libtpu: 0.0.40
codegen_flags: <defaults>
</compile_context>

<pallas_src>
from functools import lru_cache, partial

import numpy as np
import jax
import jax.numpy as jnp
from jax.experimental import pallas as pl
from jax.experimental.pallas import tpu as pltpu


def _round_up(a: int, b: int) -> int:
    return ((a + b - 1) // b) * b


# --------------------------------------------------------------------------- #
# Circulant-orientation probe: pins the pltpu.roll convention with an explicit #
# exact-equality unit check (reviewer request), instead of a silent fallback.  #
# --------------------------------------------------------------------------- #
@lru_cache(maxsize=None)
def _circulant_roll_stride(n: int):
    """Stride s such that pltpu.roll(broadcast(key), 0, 1, stride=s, stride_axis=0)
    yields kmat[j, k] = key[(k - j) % n]; None -> host-built circulant fallback."""
    want = ((np.arange(n)[None, :] - np.arange(n)[:, None]) % n).astype(np.float32)
    row = jnp.arange(n, dtype=jnp.float32)[None, :]
    for stride in (1, n - 1):
        def probe(v_ref, o_ref, _s=stride):
            o_ref[...] = pltpu.roll(jnp.broadcast_to(v_ref[...], (n, n)), 0, 1,
                                    stride=_s, stride_axis=0)
        try:
            got = pl.pallas_call(
                probe, out_shape=jax.ShapeDtypeStruct((n, n), jnp.float32))(row)
            got = np.asarray(jax.block_until_ready(got))
        except Exception:
            continue
        if np.array_equal(got, want):
            return stride
    return None


# --------------------------------------------------------------------------- #
# Kernel                                                                       #
# --------------------------------------------------------------------------- #
def _make_kernel(n: int, roll_stride):
    f32 = jnp.float32

    def kernel(c_ref, km_ref, x_ref, o1_ref, o2_ref, res_ref):
        # ---- circulants (batch-invariant) ---------------------------------
        if roll_stride is not None:
            # c_ref: (2, n) rows [key, w] with w[b] = key[(-b) % n].
            kmat = pltpu.roll(jnp.broadcast_to(c_ref[0:1, :], (n, n)), 0, 1,
                              stride=roll_stride, stride_axis=0)    # key[(k-j)%n]
            kmatT = pltpu.roll(jnp.broadcast_to(c_ref[1:2, :], (n, n)), 0, 1,
                               stride=roll_stride, stride_axis=0)   # key[(j-k)%n]
        else:
            # c_ref: (2n, n) host-built [kmat; kmat^T] fallback.
            kmat = c_ref[0:n, :]
            kmatT = c_ref[n:2 * n, :]

        # ---- batch-invariant diagonals (redun1 / redun3 terms) -------------
        km_bf = km_ref[...]                          # (2n, n) bf16: [km1; km2]
        km_f = km_bf.astype(f32)                     # f32 elementwise (v5e-safe VPU)
        d_cols = jnp.concatenate(
            [jnp.sum(kmat * km_f[0:n, :], axis=1, keepdims=True),        # redun1
             jnp.sum(kmat * km_f[n:2 * n, :], axis=1, keepdims=True)],
            axis=1)                                  # (n, 2)
        d_rows = jnp.transpose(d_cols)               # one small XLU transpose -> (2, n)
        d1 = d_rows[0:1, :]
        d2 = d_rows[1:2, :]

        # ---- batched part ---------------------------------------------------
        o1 = o1_ref[...]                             # (tb, n) f32
        o2 = o2_ref[...]
        # Fused prologue matvec: [o1 o2] @ [km1; km2] -- one 2n-deep bf16 MXU pass.
        o12 = jnp.concatenate([o1, o2], axis=1).astype(jnp.bfloat16)     # (tb, 2n)
        v12 = jnp.dot(o12, km_bf, preferred_element_type=f32)            # (tb, n)
        u = x_ref[...] - v12

        # s[b, j] = sum_k u[b, k] * key[(k - j) % n]  == u @ kmat^T, computed
        # MXU-naturally against the pre-built kmatT (no hidden (n, n) transpose).
        s = jnp.dot(u, kmatT, preferred_element_type=f32)                # (tb, n)

        # 1/redun1 on the EUP: approx seed + one Newton step.  Assumes the
        # divisor redun1 (== d1) stays well away from zero, as in the original.
        inv1 = pl.reciprocal(d1, approx=True)
        inv1 = inv1 * (2.0 - d1 * inv1)

        res_ref[...] = (s + d2 * o2) * inv1 + o1     # lane-dense (tb, n) store

    return kernel


# --------------------------------------------------------------------------- #
# Wrappers                                                                     #
# --------------------------------------------------------------------------- #
@partial(jax.jit, static_argnames=("roll_stride",))
def _cc_batched(key, X, km1, O1, km2, O2, *, roll_stride):
    f32 = jnp.float32
    B0, n = X.shape
    if key.shape[0] != n:
        raise ValueError("original forward indexing requires len(key) == len(input_x)")

    # Batch tiling: one block when B0 <= 128, otherwise 128-row tiles over a grid.
    tb = min(128, _round_up(B0, 8))
    bp = _round_up(B0, tb)
    pad = bp - B0

    def prep(a):
        a = a.astype(f32)
        return jnp.pad(a, ((0, pad), (0, 0))) if pad else a

    Xp, O1p, O2p = prep(X), prep(O1), prep(O2)
    km = jnp.concatenate([km1, km2], axis=0).astype(jnp.bfloat16)        # (2n, n) bf16

    key32 = key.astype(f32)
    if roll_stride is not None:
        w = jnp.roll(key32[::-1], 1)                                     # w[b] = key[(-b)%n]
        first = jnp.stack([key32, w], axis=0)                            # (2, n)
        first_spec = pl.BlockSpec((2, n), lambda i: (0, 0))
    else:
        idx = (jnp.arange(n)[None, :] - jnp.arange(n)[:, None]) % n
        kmat_h = key32[idx]                                              # (n, n) gather
        first = jnp.concatenate([kmat_h, kmat_h.T], axis=0)              # (2n, n)
        first_spec = pl.BlockSpec((2 * n, n), lambda i: (0, 0))

    R = pl.pallas_call(
        _make_kernel(n, roll_stride),
        out_shape=jax.ShapeDtypeStruct((bp, n), f32),
        grid=(bp // tb,),
        in_specs=[first_spec,
                  pl.BlockSpec((2 * n, n), lambda i: (0, 0)),            # km, resident
                  pl.BlockSpec((tb, n), lambda i: (i, 0)),               # x
                  pl.BlockSpec((tb, n), lambda i: (i, 0)),               # o1
                  pl.BlockSpec((tb, n), lambda i: (i, 0))],              # o2
        out_specs=pl.BlockSpec((tb, n), lambda i: (i, 0)),
        compiler_params=pltpu.CompilerParams(dimension_semantics=("parallel",)),
    )(first, km, Xp, O1p, O2p)

    if pad:
        R = R[:B0]
    # redun3 = r2[n-1] of the last step; it is independent of x/o1/o2, so it is a
    # single tiny f32 dot here instead of a second (1, 1) kernel output DMA.
    redun3 = jnp.dot(km2[n - 1, :].astype(f32), jnp.roll(key32, n - 1))
    return R, redun3


def circular_correlation_batched(key, X, km1, O1, km2, O2):
    """Batched forward: X/O1/O2 are (B, n). Returns (result (B, n), redun3 scalar)."""
    n = int(X.shape[-1])
    return _cc_batched(key, X, km1, O1, km2, O2,
                       roll_stride=_circulant_roll_stride(n))


def circular_correlation(key, input_x, key_matrix1, input_o1, key_matrix2, input_o2):
    """Original single-vector module signature. Returns (result (n,), redun3 scalar)."""
    R, r3 = circular_correlation_batched(key, input_x[None, :], key_matrix1,
                                         input_o1[None, :], key_matrix2,
                                         input_o2[None, :])
    return R[0], r3


# --------------------------------------------------------------------------- #
# Literal float64 reference of the PyTorch double loop                         #
# --------------------------------------------------------------------------- #
def _reference(key, input_x, km1, o1, km2, o2):
    key = np.asarray(key, np.float64); input_x = np.asarray(input_x, np.float64)
    km1 = np.asarray(km1, np.float64); o1 = np.asarray(o1, np.float64)
    km2 = np.asarray(km2, np.float64); o2 = np.asarray(o2, np.float64)
    n, m = input_x.shape[0], key.shape[0]
    result = np.zeros(n, np.float64)
    redun3 = None
    for j in range(n):
        temp = np.array([key[(k - j) % m] for k in range(m)], np.float64)
        acc = float(np.dot(input_x, temp))
        r1 = km1 @ temp
        redun1 = r1[j]
        redun2 = np.dot(np.delete(r1, j), np.delete(o1, j))
        r2 = km2 @ temp
        redun3 = r2[j]
        redun4 = np.dot(np.delete(r2, j), np.delete(o2, j))
        result[j] = (acc - redun2 - redun4) / redun1
    return result, redun3


if __name__ == "__main__":
    n, B = 128, 4
    rng = jax.random.PRNGKey(0)
    ks = jax.random.split(rng, 6)
    # Positive-valued inputs keep redun1 (the divisor) well away from zero.
    key_vec = jax.random.uniform(ks[0], (n,), jnp.float32, 0.5, 1.5)
    km1 = jax.random.uniform(ks[1], (n, n), jnp.float32, 0.5, 1.5)
    km2 = jax.random.uniform(ks[2], (n, n), jnp.float32, 0.5, 1.5)
    X = jax.random.uniform(ks[3], (B, n), jnp.float32, 0.5, 1.5)
    O1 = jax.random.uniform(ks[4], (B, n), jnp.float32, 0.5, 1.5)
    O2 = jax.random.uniform(ks[5], (B, n), jnp.float32, 0.5, 1.5)

    refs = [_reference(key_vec, X[b], km1, O1[b], km2, O2[b]) for b in range(B)]
    ref_rows = np.stack([r[0] for r in refs])
    ref_r3 = float(refs[0][1])

    ok = True

    # 1) Batched call (B=4, single grid step, batch padded 4 -> 8 internally).
    R, r3 = circular_correlation_batched(key_vec, X, km1, O1, km2, O2)
    R = np.asarray(jax.block_until_ready(R)); r3 = float(jax.block_until_ready(r3))
    ok &= np.allclose(R, ref_rows, rtol=2e-3, atol=2e-3)
    ok &= np.allclose(r3, ref_r3, rtol=1e-3, atol=1e-3)

    # 2) Original single-vector module signature (batch of 1).
    res0, r3b = circular_correlation(key_vec, X[0], km1, O1[0], km2, O2[0])
    res0 = np.asarray(jax.block_until_ready(res0)); r3b = float(jax.block_until_ready(r3b))
    ok &= np.allclose(res0, ref_rows[0], rtol=2e-3, atol=2e-3)
    ok &= np.allclose(r3b, ref_r3, rtol=1e-3, atol=1e-3)

    # 3) Larger batch exercising a multi-step "parallel" grid: 256 rows = 64x
    #    tiled copies of the 4 reference rows; every row must match its reference.
    reps = 64
    Rb, _ = circular_correlation_batched(key_vec, jnp.tile(X, (reps, 1)), km1,
                                         jnp.tile(O1, (reps, 1)), km2,
                                         jnp.tile(O2, (reps, 1)))
    Rb = np.asarray(jax.block_until_ready(Rb))
    ok &= np.allclose(Rb, np.tile(ref_rows, (reps, 1)), rtol=2e-3, atol=2e-3)

    if not ok:
        raise SystemExit("result mismatch vs reference")
    print("KERNEL_OK")
</pallas_src>

<mosaic_0001>
module attributes {stable_mosaic.version = 11 : i64} {
  func.func @probe(%arg0: memref<1x128xf32, #tpu.memory_space<vmem>>, %arg1: memref<128x128xf32, #tpu.memory_space<vmem>>) attributes {dimension_semantics = [], scalar_prefetch = 0 : i64, scratch_operands = 0 : i64, tpu.core_type = #tpu.core_type<tc>} {
    %c0 = arith.constant 0 : index
    %c0_0 = arith.constant 0 : index
    %0 = vector.load %arg0[%c0, %c0_0] : memref<1x128xf32, #tpu.memory_space<vmem>>, vector<1x128xf32>
    %1 = vector.shape_cast %0 : vector<1x128xf32> to vector<1x128xf32>
    %2 = vector.broadcast %1 : vector<1x128xf32> to vector<128x128xf32>
    %c0_i32 = arith.constant 0 : i32
    %3 = tpu.dynamic_rotate %2 by %c0_i32 dim 1 {stride = 1 : si32, stride_dimension = 0 : si32} : vector<128x128xf32>, i32 -> vector<128x128xf32>
    %c0_1 = arith.constant 0 : index
    %c0_2 = arith.constant 0 : index
    %4 = vector.load %arg1[%c0_1, %c0_2] : memref<128x128xf32, #tpu.memory_space<vmem>>, vector<128x128xf32>
    tpu.vector_store %arg1[%c0_1, %c0_2], %3 {strides = array<i32>} : memref<128x128xf32, #tpu.memory_space<vmem>>, vector<128x128xf32>,
    return
  }
}

module attributes {stable_mosaic.version = 11 : i64} {
  func.func @probe(%arg0: memref<1x128xf32, #tpu.memory_space<vmem>>, %arg1: memref<128x128xf32, #tpu.memory_space<vmem>>) attributes {dimension_semantics = [], scalar_prefetch = 0 : i64, scratch_operands = 0 : i64, tpu.core_type = #tpu.core_type<tc>} {
    %c0 = arith.constant 0 : index
    %c0_0 = arith.constant 0 : index
    %0 = vector.load %arg0[%c0, %c0_0] : memref<1x128xf32, #tpu.memory_space<vmem>>, vector<1x128xf32>
    %1 = vector.shape_cast %0 : vector<1x128xf32> to vector<1x128xf32>
    %2 = vector.broadcast %1 : vector<1x128xf32> to vector<128x128xf32>
    %c0_i32 = arith.constant 0 : i32
    %3 = tpu.dynamic_rotate %2 by %c0_i32 dim 1 {stride = 127 : si32, stride_dimension = 0 : si32} : vector<128x128xf32>, i32 -> vector<128x128xf32>
    %c0_1 = arith.constant 0 : index
    %c0_2 = arith.constant 0 : index
    %4 = vector.load %arg1[%c0_1, %c0_2] : memref<128x128xf32, #tpu.memory_space<vmem>>, vector<128x128xf32>
    tpu.vector_store %arg1[%c0_1, %c0_2], %3 {strides = array<i32>} : memref<128x128xf32, #tpu.memory_space<vmem>>, vector<128x128xf32>,
    return
  }
}

module attributes {stable_mosaic.version = 11 : i64} {
  func.func @kernel(%arg0: i32, %arg1: memref<256x128xf32, #tpu.memory_space<vmem>>, %arg2: memref<256x128xbf16, #tpu.memory_space<vmem>>, %arg3: memref<8x128xf32, #tpu.memory_space<vmem>>, %arg4: memref<8x128xf32, #tpu.memory_space<vmem>>, %arg5: memref<8x128xf32, #tpu.memory_space<vmem>>, %arg6: memref<8x128xf32, #tpu.memory_space<vmem>>) attributes {dimension_semantics = [#tpu.dimension_semantics<parallel>], iteration_bounds = array<i64: 1>, scalar_prefetch = 0 : i64, scratch_operands = 0 : i64, tpu.core_type = #tpu.core_type<tc>, window_params = [{pipeline_mode = #tpu.pipeline_mode<synchronous>, transform_indices = @transform_0, window_bounds = array<i64: 256, 128>}, {pipeline_mode = #tpu.pipeline_mode<synchronous>, transform_indices = @transform_1, window_bounds = array<i64: 256, 128>}, {transform_indices = @transform_2, window_bounds = array<i64: 8, 128>}, {transform_indices = @transform_3, window_bounds = array<i64: 8, 128>}, {transform_indices = @transform_4, window_bounds = array<i64: 8, 128>}, {transform_indices = @transform_5, window_bounds = array<i64: 8, 128>}]} {
    %c0 = arith.constant 0 : index
    %c0_0 = arith.constant 0 : index
    %0 = vector.load %arg1[%c0, %c0_0] : memref<256x128xf32, #tpu.memory_space<vmem>>, vector<128x128xf32>
    %c128 = arith.constant 128 : index
    %c0_1 = arith.constant 0 : index
    %1 = vector.load %arg1[%c128, %c0_1] : memref<256x128xf32, #tpu.memory_space<vmem>>, vector<128x128xf32>
    %c0_2 = arith.constant 0 : index
    %c0_3 = arith.constant 0 : index
    %2 = vector.load %arg2[%c0_2, %c0_3] : memref<256x128xbf16, #tpu.memory_space<vmem>>, vector<256x128xbf16>
    %3 = arith.extf %2 : vector<256x128xbf16> to vector<256x128xf32>
    %4 = vector.extract_strided_slice %3 {offsets = [0, 0], sizes = [128, 128], strides = [1, 1]} : vector<256x128xf32> to vector<128x128xf32>
    %5 = arith.mulf %0, %4 : vector<128x128xf32>
    %cst = arith.constant dense<0.000000e+00> : vector<128xf32>
    %6 = vector.multi_reduction <add>, %5, %cst [1] : vector<128x128xf32> to vector<128xf32>
    %7 = vector.shape_cast %6 : vector<128xf32> to vector<128x1xf32>
    %8 = vector.extract_strided_slice %3 {offsets = [128, 0], sizes = [128, 128], strides = [1, 1]} : vector<256x128xf32> to vector<128x128xf32>
    %9 = arith.mulf %0, %8 : vector<128x128xf32>
    %cst_4 = arith.constant dense<0.000000e+00> : vector<128xf32>
    %10 = vector.multi_reduction <add>, %9, %cst_4 [1] : vector<128x128xf32> to vector<128xf32>
    %11 = vector.shape_cast %10 : vector<128xf32> to vector<128x1xf32>
    %12 = tpu.concatenate %7, %11 in 1 : vector<128x1xf32>, vector<128x1xf32> -> vector<128x2xf32>
    %13 = tpu.transpose %12, [1, 0] : vector<128x2xf32> -> vector<2x128xf32>
    %14 = vector.extract_strided_slice %13 {offsets = [0, 0], sizes = [1, 128], strides = [1, 1]} : vector<2x128xf32> to vector<1x128xf32>
    %15 = vector.extract_strided_slice %13 {offsets = [1, 0], sizes = [1, 128], strides = [1, 1]} : vector<2x128xf32> to vector<1x128xf32>
    %c0_5 = arith.constant 0 : index
    %c0_6 = arith.constant 0 : index
    %16 = vector.load %arg4[%c0_5, %c0_6] : memref<8x128xf32, #tpu.memory_space<vmem>>, vector<8x128xf32>
    %c0_7 = arith.constant 0 : index
    %c0_8 = arith.constant 0 : index
    %17 = vector.load %arg5[%c0_7, %c0_8] : memref<8x128xf32, #tpu.memory_space<vmem>>, vector<8x128xf32>
    %18 = tpu.concatenate %16, %17 in 1 : vector<8x128xf32>, vector<8x128xf32> -> vector<8x256xf32>
    %19 = arith.truncf %18 : vector<8x256xf32> to vector<8x256xbf16>
    %cst_9 = arith.constant dense<0.000000e+00> : vector<8x128xf32>
    %20 = tpu.matmul %19, %2, %cst_9 {dimension_numbers = #tpu.dot_dimension_numbers<[1], [0], [0], [1], [0, 0, 1, 1], [], []>} : vector<8x256xbf16>, vector<256x128xbf16>, vector<8x128xf32> -> vector<8x128xf32>
    %c0_10 = arith.constant 0 : index
    %c0_11 = arith.constant 0 : index
    %21 = vector.load %arg3[%c0_10, %c0_11] : memref<8x128xf32, #tpu.memory_space<vmem>>, vector<8x128xf32>
    %22 = arith.subf %21, %20 : vector<8x128xf32>
    %cst_12 = arith.constant dense<0.000000e+00> : vector<8x128xf32>
    %23 = tpu.matmul %22, %1, %cst_12 {dimension_numbers = #tpu.dot_dimension_numbers<[1], [0], [0], [1], [0, 0, 1, 1], [], []>} : vector<8x128xf32>, vector<128x128xf32>, vector<8x128xf32> -> vector<8x128xf32>
    %24 = tpu.reciprocal %14 {approx = true} : vector<1x128xf32> -> vector<1x128xf32>
    %25 = arith.mulf %14, %24 : vector<1x128xf32>
    %cst_13 = arith.constant 2.000000e+00 : f32
    %26 = vector.broadcast %cst_13 : f32 to vector<1x128xf32>
    %27 = arith.subf %26, %25 : vector<1x128xf32>
    %28 = arith.mulf %24, %27 : vector<1x128xf32>
    %29 = vector.broadcast %15 : vector<1x128xf32> to vector<8x128xf32>
    %30 = arith.mulf %29, %17 : vector<8x128xf32>
    %31 = arith.addf %23, %30 : vector<8x128xf32>
    %32 = vector.broadcast %28 : vector<1x128xf32> to vector<8x128xf32>
    %33 = arith.mulf %31, %32 : vector<8x128xf32>
    %34 = arith.addf %33, %16 : vector<8x128xf32>
    %c0_14 = arith.constant 0 : index
    %c0_15 = arith.constant 0 : index
    %35 = vector.load %arg6[%c0_14, %c0_15] : memref<8x128xf32, #tpu.memory_space<vmem>>, vector<8x128xf32>
    tpu.vector_store %arg6[%c0_14, %c0_15], %34 {strides = array<i32>} : memref<8x128xf32, #tpu.memory_space<vmem>>, vector<8x128xf32>,
    return
  }
  func.func @transform_0(%arg0: i32) -> (i32, i32) {
    %c0_i32 = arith.constant 0 : i32
    %c0_i32_0 = arith.constant 0 : i32
    %c0_i32_1 = arith.constant 0 : i32
    return %c0_i32, %c0_i32_0 : i32, i32
  }
  func.func @transform_1(%arg0: i32) -> (i32, i32) {
    %c0_i32 = arith.constant 0 : i32
    %c0_i32_0 = arith.constant 0 : i32
    %c0_i32_1 = arith.constant 0 : i32
    return %c0_i32, %c0_i32_0 : i32, i32
  }
  func.func @transform_2(%arg0: i32) -> (i32, i32) {
    %c0_i32 = arith.constant 0 : i32
    %c0_i32_0 = arith.constant 0 : i32
    return %arg0, %c0_i32 : i32, i32
  }
  func.func @transform_3(%arg0: i32) -> (i32, i32) {
    %c0_i32 = arith.constant 0 : i32
    %c0_i32_0 = arith.constant 0 : i32
    return %arg0, %c0_i32 : i32, i32
  }
  func.func @transform_4(%arg0: i32) -> (i32, i32) {
    %c0_i32 = arith.constant 0 : i32
    %c0_i32_0 = arith.constant 0 : i32
    return %arg0, %c0_i32 : i32, i32
  }
  func.func @transform_5(%arg0: i32) -> (i32, i32) {
    %c0_i32 = arith.constant 0 : i32
    %c0_i32_0 = arith.constant 0 : i32
    return %arg0, %c0_i32 : i32, i32
  }
}

</mosaic_0001>

<bundles_post_ra>
// kernel: tpu_custom_call.1
= control target key start
LH: loop header
LB: loop body
LE: loop exit
PB: predicated region body
PF: predicated region fallthrough
CT: control target
= control target key end

     0   :  { %6 = vsyncpa [#allocation3], 0  ;;  %s247_s0 = inlined_call_operand.hbm [shape: f32[1,128], index: 0, kind: input, shape index: {}]   ;;  %s248_s1 = inlined_call_operand.hbm [shape: f32[128,128], index: 1, kind: output, shape index: {}]  }
   0x1   :  { %7 = vsyncpa [#allocation4], 0  ;;  %s193_s6 = smov [#allocation2]   ;;  %s145_s10 = scalar_lea.hbm %s247_s0, 16 }
   0x2   :  { %s14_s7 = sshll.u32 %s193_s6, 4  ;;  %p146_p0 = scmp.ne.s32.totalorder %s247_s0, %s145_s10  ;;  %s15_s7 = int_to_ptr.vmem [resolvable:$true] %s14_s7 }
   0x3   :  { %p149_p1 = scmp.lt.u32.totalorder %s145_s10, %s247_s0 }
   0x5   :  { %p151_p2 = pnand %p149_p1, %p146_p0 }
   0x7   :  { %154 = shalt.err (!%p151_p2)
}
   0x8   :  { %s155_s15 = scalar_lea.vmem %s15_s7, 16  ;;  %s159_s16 = scalar_lea.vmem %s15_s7, 32 }
   0x9   :  { %p156_p3 = scmp.ne.s32.totalorder %s15_s7, %s155_s15  ;;  %p160_p4 = scmp.lt.s32.totalorder %s15_s7, %s15_s7 }
   0xa   :  { %p161_p5 = scmp.lt.s32.totalorder %s159_s16, %s155_s15 }
   0xc   :  { %p162_p6 = por %p161_p5, %p160_p4 }
   0xe   :  { %p163_p7 = pnand %p162_p6, %p156_p3 }
  0x10   :  { %166 = shalt.err (!%p163_p7)
}
  0x11   :  { %17 = dma.hbm_to_vmem [thread:$0]  %s247_s0, 16, %s15_s7, [#allocation3]  }
  0x12   :  { %189 = dma.done.wait [#allocation3], 16  }
  0x13   :  { %190 = vsyncadd [#allocation3], 4294967280  ;;  %v124_v0 = vld [vmem:[#allocation2] ss:$0 sm:$0xff]  ;;  %s194_s19 = smov 272   ;;  %s195_s20 = smov 256  }
  0x14   :  { %37 = vrot.lane.b32.xlu1 %v124_v0, %s194_s19  ;;  %29 = vrot.lane.b32.xlu0 %v124_v0, %s195_s20  ;;  %s196_s21 = smov 280   ;;  %s197_s22 = smov 264  }
  0x15   :  { %s198_s23 = smov 296   ;;  %s199_s24 = smov 288  }
  0x16   :  { %s200_s25 = smov 312   ;;  %s201_s26 = smov 304  }
  0x17   :  { %s202_s0 = smov 328   ;;  %s203_s27 = smov 320  }
  0x18   :  { %41 = vrot.lane.b32.xlu1 %v124_v0, %s196_s21  ;;  %33 = vrot.lane.b32.xlu0 %v124_v0, %s197_s22  ;;  %s204_s28 = smov 344   ;;  %s205_s29 = smov 336  }
  0x19   :  { %s206_s30 = smov 360   ;;  %s207_s2 = smov 352  }
  0x1a   :  { %s208_s3 = smov 376   ;;  %s209_s4 = smov 368  }
  0x1b   :  { %s210_s5 = smov [#allocation5]  }
  0x1c   :  { %49 = vrot.lane.b32.xlu1 %v124_v0, %s198_s23  ;;  %45 = vrot.lane.b32.xlu0 %v124_v0, %s199_s24  ;;  %s112_s6 = sshll.u32 %s210_s5, 4  ;;  %s113_s6 = int_to_ptr.vmem [resolvable:$true] %s112_s6 }
  0x1d   :  { %s167_s7 = scalar_lea.vmem %s113_s6, 2048  ;;  %p172_p9 = scmp.lt.s32.totalorder %s113_s6, %s113_s6 }
  0x1e   :  { %p168_p8 = scmp.ne.s32.totalorder %s113_s6, %s167_s7  ;;  %p173_p10 = scmp.lt.s32.totalorder %s167_s7, %s167_s7 }
  0x20   :  { %57 = vrot.lane.b32.xlu1 %v124_v0, %s200_s25  ;;  %53 = vrot.lane.b32.xlu0 %v124_v0, %s201_s26  ;;  %p174_p11 = por %p173_p10, %p172_p9 }
  0x22   :  { %p175_p12 = pnand %p174_p11, %p168_p8 }
  0x24   :  { %65 = vrot.lane.b32.xlu1 %v124_v0, %s202_s0  ;;  %61 = vrot.lane.b32.xlu0 %v124_v0, %s203_s27 }
  0x28   :  { %73 = vrot.lane.b32.xlu1 %v124_v0, %s204_s28  ;;  %69 = vrot.lane.b32.xlu0 %v124_v0, %s205_s29 }
  0x2c   :  { %81 = vrot.lane.b32.xlu1 %v124_v0, %s206_s30  ;;  %77 = vrot.lane.b32.xlu0 %v124_v0, %s207_s2 }
  0x30   :  { %89 = vrot.lane.b32.xlu1 %v124_v0, %s208_s3  ;;  %85 = vrot.lane.b32.xlu0 %v124_v0, %s209_s4 }
  0x86   :  { %v38_v1 = vpop.permute.xlu1 %37  ;;  %v30_v2 = vpop.permute.xlu0 %29 }
  0x87   :  { %93 = vst [vmem:[#allocation5 + $0x10] sm:$0xff] %v38_v1  ;;  %91 = vst [vmem:[#allocation5] sm:$0xff] %v30_v2 }
  0x8a   :  { %v42_v3 = vpop.permute.xlu1 %41  ;;  %v34_v4 = vpop.permute.xlu0 %33 }
  0x8b   :  { %94 = vst [vmem:[#allocation5 + $0x18] sm:$0xff] %v42_v3  ;;  %92 = vst [vmem:[#allocation5 + $0x8] sm:$0xff] %v34_v4 }
  0x8e   :  { %v50_v5 = vpop.permute.xlu1 %49  ;;  %v46_v6 = vpop.permute.xlu0 %45 }
  0x8f   :  { %96 = vst [vmem:[#allocation5 + $0x28] sm:$0xff] %v50_v5  ;;  %95 = vst [vmem:[#allocation5 + $0x20] sm:$0xff] %v46_v6 }
  0x92   :  { %v58_v7 = vpop.permute.xlu1 %57  ;;  %v54_v8 = vpop.permute.xlu0 %53 }
  0x93   :  { %98 = vst [vmem:[#allocation5 + $0x38] sm:$0xff] %v58_v7  ;;  %97 = vst [vmem:[#allocation5 + $0x30] sm:$0xff] %v54_v8 }
  0x96   :  { %v66_v9 = vpop.permute.xlu1 %65  ;;  %v62_v10 = vpop.permute.xlu0 %61 }
  0x97   :  { %100 = vst [vmem:[#allocation5 + $0x48] sm:$0xff] %v66_v9  ;;  %99 = vst [vmem:[#allocation5 + $0x40] sm:$0xff] %v62_v10 }
  0x9a   :  { %v74_v11 = vpop.permute.xlu1 %73  ;;  %v70_v12 = vpop.permute.xlu0 %69 }
  0x9b   :  { %102 = vst [vmem:[#allocation5 + $0x58] sm:$0xff] %v74_v11  ;;  %101 = vst [vmem:[#allocation5 + $0x50] sm:$0xff] %v70_v12 }
  0x9e   :  { %v82_v13 = vpop.permute.xlu1 %81  ;;  %v78_v14 = vpop.permute.xlu0 %77 }
  0x9f   :  { %104 = vst [vmem:[#allocation5 + $0x68] sm:$0xff] %v82_v13  ;;  %103 = vst [vmem:[#allocation5 + $0x60] sm:$0xff] %v78_v14 }
  0xa2   :  { %v90_v15 = vpop.permute.xlu1 %89  ;;  %v86_v16 = vpop.permute.xlu0 %85 }
  0xa3   :  { %106 = vst [vmem:[#allocation5 + $0x78] sm:$0xff] %v90_v15  ;;  %105 = vst [vmem:[#allocation5 + $0x70] sm:$0xff] %v86_v16 }
  0xa4   :  { %178 = shalt.err (!%p175_p12)
}
  0xa5   :  { %s179_s10 = scalar_lea.hbm %s248_s1, 2048 }
  0xa6   :  { %p180_p13 = scmp.ne.s32.totalorder %s248_s1, %s179_s10  ;;  %p183_p0 = scmp.lt.u32.totalorder %s179_s10, %s248_s1 }
  0xa8   :  { %p185_p1 = pnand %p183_p0, %p180_p13 }
  0xaa   :  { %188 = shalt.err (!%p185_p1)
}
  0xab   :  { %s211_s15 = smov 128   ;;  %s212_s16 = smov 8  }
  0xac   :  { %118 = dma.vmem_to_hbm [thread:$0]  %s113_s6, 2048, %s248_s1, [#allocation4], %s211_s15, %s211_s15, %s212_s16  }
  0xad   :  { %191 = dma.done.wait [#allocation4], 2048  }
  0xae   :  { %192 = vsyncadd [#allocation4], 4294965248 }
  0xaf   :  { %122 = vsyncpa [#allocation3], 1 }
  0xb0   :  { %123 = vsyncpa [#allocation4], 1 }

// kernel: _cc_batched.1
= control target key start
LH: loop header
LB: loop body
LE: loop exit
PB: predicated region body
PF: predicated region fallthrough
CT: control target
= control target key end

     0   :  { %v645_v3 = vmov 0.0|0.0   ;;  %vm646_vm0 = vmmov 0   ;;  %vm213_vm1 = vcmask 7168   ;;  %s928_s1 = inlined_call_operand.vmem [shape: bf16[256,128], index: 1, kind: input, shape index: {}]   ;;  %s929_s4 = inlined_call_operand.vmem [shape: f32[8,128], index: 4, kind: input, shape index: {}]   ;;  %s930_s0 = inlined_call_operand.vmem [shape: f32[256,128], index: 0, kind: input, shape index: {}]   ;;  %s931_s3 = inlined_call_operand.vmem [shape: f32[8,128], index: 3, kind: input, shape index: {}]   ;;  %s932_s2 = inlined_call_operand.vmem [shape: f32[8,128], index: 2, kind: input, shape index: {}]   ;;  %s933_s5 = inlined_call_operand.vmem [shape: f32[8,128], index: 5, kind: output, shape index: {}]  }
   0x1   :  { %v69_v0 = vld [vmem:[%s928_s1 + $0x40] sm:$0xff]   ;;  %v71_v2 = vld [vmem:[%s928_s1 + $0x48] sm:$0xff]   ;;  %584 = vmatprep.subr.bf16.mxu1 %v645_v3  ;;  %v694_v5 = vld [vmem:[%s928_s1 + $0x50] sm:$0xff]  }
   0x2   :  { %v53_v1 = vld [vmem:[%s928_s1] sm:$0xff]   ;;  %v55_v4 = vld [vmem:[%s928_s1 + $0x8] sm:$0xff]   ;;  %510 = vmatprep.subr.bf16.mxu0 %v69_v0  ;;  %v101_v8 = vunpack.c.l.bf16 %v69_v0  ;;  %v699_v9 = vld [vmem:[%s928_s1 + $0x10] sm:$0xff]   ;;  %v102_v11 = vunpack.c.h.bf16 %v69_v0  ;;  %v103_v24 = vunpack.c.l.bf16 %v71_v2  ;;  %v104_v31 = vunpack.c.h.bf16 %v71_v2 }
   0x3   :  { %v85_v6 = vunpack.c.l.bf16 %v53_v1  ;;  %511 = vmatpush3.bf16.msra.mxu0 %v53_v1  ;;  %v86_v7 = vunpack.c.h.bf16 %v53_v1  ;;  %v704_v10 = vld [vmem:[%s929_s4] sm:$0xff]  ;;  %v709_v12 = vld [vmem:[%s928_s1 + $0x58] sm:$0xff]   ;;  %v22_v15 = vld [vmem:[%s930_s0 + $0x8] sm:$0xff]  ;;  %v87_v20 = vunpack.c.l.bf16 %v55_v4  ;;  %v88_v27 = vunpack.c.h.bf16 %v55_v4 }
   0x4   :  { %512 = vmatprep.subr.bf16.mxu0 %v71_v2  ;;  %v265_v13 = vpack.c.bf16 %v704_v10, %v704_v10  ;;  %v21_v14 = vld [vmem:[%s930_s0] sm:$0xff]  ;;  %v723_v18 = vld [vmem:[%s928_s1 + $0x18] sm:$0xff]   ;;  %v166_v22 = vmul.f32 %v102_v11, %v22_v15  ;;  %v23_v23 = vld [vmem:[%s930_s0 + $0x10] sm:$0xff]  ;;  %v89_v34 = vunpack.c.l.bf16 %v699_v9  ;;  %v105_v40 = vunpack.c.l.bf16 %v694_v5 }
   0x5   :  { %v117_v16 = vmul.f32 %v85_v6, %v21_v14  ;;  %v118_v17 = vmul.f32 %v86_v7, %v22_v15  ;;  %v165_v19 = vmul.f32 %v101_v8, %v21_v14  ;;  %v728_v21 = vld [vmem:[%s928_s1 + $0x60] sm:$0xff]   ;;  %v119_v26 = vmul.f32 %v87_v20, %v23_v23  ;;  %v743_v28 = vld [vmem:[%s928_s1 + $0x68] sm:$0xff]   ;;  %v24_v30 = vld [vmem:[%s930_s0 + $0x18] sm:$0xff] }
   0x6   :  { %394 = vmatprep.mubr.bf16.mxu0 %v265_v13  ;;  %v738_v25 = vld [vmem:[%s928_s1 + $0x20] sm:$0xff]   ;;  %v167_v29 = vmul.f32 %v103_v24, %v23_v23  ;;  %v753_v32 = vld [vmem:[%s928_s1 + $0x28] sm:$0xff]   ;;  %v120_v33 = vmul.f32 %v88_v27, %v24_v30  ;;  %v765_v37 = vld [vmem:[%s928_s1 + $0x70] sm:$0xff]   ;;  %v168_v38 = vmul.f32 %v104_v31, %v24_v30  ;;  %v90_v46 = vunpack.c.h.bf16 %v699_v9 }
   0x7   :  { %513 = vmatpush3.bf16.msra.mxu0 %v55_v4  ;;  %133 = vadd.xlane.f32.xlu0 %v117_v16  ;;  %v37_v35 = vld [vmem:[%s930_s0 + $0x80] sm:$0xff]  ;;  %v38_v36 = vld [vmem:[%s930_s0 + $0x88] sm:$0xff]  ;;  %v39_v41 = vld [vmem:[%s930_s0 + $0x90] sm:$0xff]  ;;  %v106_v50 = vunpack.c.h.bf16 %v694_v5  ;;  %v91_v56 = vunpack.c.l.bf16 %v723_v18  ;;  %v107_v59 = vunpack.c.l.bf16 %v709_v12  ;;  %v92_v1 = vunpack.c.h.bf16 %v723_v18 }
   0x8   :  { %514 = vmatprep.subr.bf16.mxu0 %v694_v5  ;;  %135 = vadd.xlane.f32.xlu1 %v118_v17  ;;  %v25_v39 = vld [vmem:[%s930_s0 + $0x20] sm:$0xff]  ;;  %v40_v42 = vld [vmem:[%s930_s0 + $0x98] sm:$0xff]  ;;  %v585_v43 = vpack.c.bf16 %v38_v36, %v37_v35  ;;  %v782_v44 = vld [vmem:[%s928_s1 + $0x30] sm:$0xff]   ;;  %v108_v5 = vunpack.c.h.bf16 %v709_v12  ;;  %v109_v15 = vunpack.c.l.bf16 %v728_v21  ;;  %v94_v20 = vunpack.c.h.bf16 %v738_v25 }
   0x9   :  { %v121_v45 = vmul.f32 %v89_v34, %v25_v39  ;;  %v788_v47 = vld [vmem:[%s928_s1 + $0x78] sm:$0xff]   ;;  %v169_v48 = vmul.f32 %v105_v40, %v25_v39  ;;  %v26_v49 = vld [vmem:[%s930_s0 + $0x28] sm:$0xff]  ;;  %v588_v51 = vpack.c.bf16 %v40_v42, %v39_v41  ;;  %v41_v52 = vld [vmem:[%s930_s0 + $0xa0] sm:$0xff]  ;;  %v110_v24 = vunpack.c.h.bf16 %v728_v21 }
   0xa   :  { %586 = vmatpush3.bf16.msra.mxu1 %v585_v43  ;;  %v42_v53 = vld [vmem:[%s930_s0 + $0xa8] sm:$0xff]  ;;  %v806_v54 = vld [vmem:[%s928_s1 + $0x38] sm:$0xff]   ;;  %v122_v55 = vmul.f32 %v90_v46, %v26_v49  ;;  %v170_v57 = vmul.f32 %v106_v50, %v26_v49  ;;  %v27_v58 = vld [vmem:[%s930_s0 + $0x30] sm:$0xff]  ;;  %v95_v30 = vunpack.c.l.bf16 %v753_v32  ;;  %v96_v36 = vunpack.c.h.bf16 %v753_v32 }
   0xb   :  { %515 = vmatpush3.bf16.msra.mxu0 %v699_v9  ;;  %181 = vadd.xlane.f32.xlu0 %v165_v19  ;;  %v591_v60 = vpack.c.bf16 %v42_v53, %v41_v52  ;;  %v43_v61 = vld [vmem:[%s930_s0 + $0xb0] sm:$0xff]  ;;  %v44_v62 = vld [vmem:[%s930_s0 + $0xb8] sm:$0xff]  ;;  %v824_v63 = vld [vmem:[%s931_s3] sm:$0xff]  ;;  %v123_v0 = vmul.f32 %v91_v56, %v27_v58  ;;  %v171_v2 = vmul.f32 %v107_v59, %v27_v58  ;;  %v112_v40 = vunpack.c.h.bf16 %v743_v28 }
   0xc   :  { %516 = vmatprep.subr.bf16.mxu0 %v709_v12  ;;  %183 = vadd.xlane.f32.xlu1 %v166_v22  ;;  %v28_v4 = vld [vmem:[%s930_s0 + $0x38] sm:$0xff]  ;;  %v594_v6 = vpack.c.bf16 %v44_v62, %v43_v61  ;;  %v264_v7 = vpack.c.bf16 %v824_v63, %v824_v63  ;;  %v45_v8 = vld [vmem:[%s930_s0 + $0xc0] sm:$0xff]  ;;  %v46_v9 = vld [vmem:[%s930_s0 + $0xc8] sm:$0xff]  ;;  %v93_v12 = vunpack.c.l.bf16 %v738_v25  ;;  %v97_v42 = vunpack.c.l.bf16 %v782_v44 }
   0xd   :  { %587 = vmatprep.subr.bf16.mxu1 %v645_v3  ;;  %v124_v11 = vmul.f32 %v92_v1, %v28_v4  ;;  %v172_v13 = vmul.f32 %v108_v5, %v28_v4  ;;  %v29_v14 = vld [vmem:[%s930_s0 + $0x40] sm:$0xff]  ;;  %v597_v16 = vpack.c.bf16 %v46_v9, %v45_v8  ;;  %v47_v17 = vld [vmem:[%s930_s0 + $0xd0] sm:$0xff]  ;;  %v30_v23 = vld [vmem:[%s930_s0 + $0x48] sm:$0xff]  ;;  %v114_v49 = vunpack.c.h.bf16 %v765_v37 }
   0xe   :  { %589 = vmatpush3.bf16.msra.mxu1 %v588_v51  ;;  %v125_v19 = vmul.f32 %v93_v12, %v29_v14  ;;  %v173_v22 = vmul.f32 %v109_v15, %v29_v14  ;;  %v49_v27 = vld [vmem:[%s930_s0 + $0xe0] sm:$0xff]  ;;  %v174_v31 = vmul.f32 %v110_v24, %v30_v23  ;;  %v32_v39 = vld [vmem:[%s930_s0 + $0x58] sm:$0xff]  ;;  %v99_v51 = vunpack.c.l.bf16 %v806_v54  ;;  %v35_v53 = vld [vmem:[%s930_s0 + $0x70] sm:$0xff] }
   0xf   :  { %517 = vmatpush3.bf16.msra.mxu0 %v723_v18  ;;  %137 = vadd.xlane.f32.xlu0 %v119_v26  ;;  %v48_v18 = vld [vmem:[%s930_s0 + $0xd8] sm:$0xff]  ;;  %v128_v41 = vmul.f32 %v96_v36, %v32_v39  ;;  %v176_v43 = vmul.f32 %v112_v40, %v32_v39  ;;  %v100_v56 = vunpack.c.h.bf16 %v806_v54  ;;  %v116_v58 = vunpack.c.h.bf16 %v788_v47  ;;  %v51_v61 = vld [vmem:[%s930_s0 + $0xf0] sm:$0xff] }
  0x10   :  { %518 = vmatprep.subr.bf16.mxu0 %v728_v21  ;;  %185 = vadd.xlane.f32.xlu1 %v167_v29  ;;  %v600_v26 = vpack.c.bf16 %v48_v18, %v47_v17  ;;  %v126_v29 = vmul.f32 %v94_v20, %v30_v23  ;;  %v31_v21 = vld [vmem:[%s930_s0 + $0x50] sm:$0xff] }
  0x11   :  { %590 = vmatprep.subr.bf16.mxu1 %v645_v3  ;;  %v127_v35 = vmul.f32 %v95_v30, %v31_v21 }
  0x12   :  { %592 = vmatpush3.bf16.msra.mxu1 %v591_v60 }
  0x13   :  { %519 = vmatpush3.bf16.msra.mxu0 %v738_v25  ;;  %139 = vadd.xlane.f32.xlu0 %v120_v33  ;;  %v50_v25 = vld [vmem:[%s930_s0 + $0xe8] sm:$0xff]  ;;  %v111_v33 = vunpack.c.l.bf16 %v743_v28 }
  0x14   :  { %520 = vmatprep.subr.bf16.mxu0 %v743_v28  ;;  %187 = vadd.xlane.f32.xlu1 %v168_v38  ;;  %v603_v34 = vpack.c.bf16 %v50_v25, %v49_v27 }
  0x15   :  { %593 = vmatprep.subr.bf16.mxu1 %v645_v3  ;;  %v175_v38 = vmul.f32 %v111_v33, %v31_v21 }
  0x16   :  { %595 = vmatpush3.bf16.msra.mxu1 %v594_v6 }
  0x17   :  { %521 = vmatpush3.bf16.msra.mxu0 %v753_v32  ;;  %141 = vadd.xlane.f32.xlu0 %v121_v45  ;;  %v33_v32 = vld [vmem:[%s930_s0 + $0x60] sm:$0xff]  ;;  %v113_v45 = vunpack.c.l.bf16 %v765_v37 }
  0x18   :  { %522 = vmatprep.subr.bf16.mxu0 %v765_v37  ;;  %189 = vadd.xlane.f32.xlu1 %v169_v48  ;;  %v129_v46 = vmul.f32 %v97_v42, %v33_v32  ;;  %v98_v48 = vunpack.c.h.bf16 %v782_v44  ;;  %v36_v37 = vld [vmem:[%s930_s0 + $0x78] sm:$0xff] }
  0x19   :  { %596 = vmatprep.subr.bf16.mxu1 %v645_v3  ;;  %v177_v28 = vmul.f32 %v113_v45, %v33_v32  ;;  %v132_v59 = vmul.f32 %v100_v56, %v36_v37  ;;  %v180_v60 = vmul.f32 %v116_v58, %v36_v37 }
  0x1a   :  { %598 = vmatpush3.bf16.msra.mxu1 %v597_v16 }
  0x1b   :  { %523 = vmatpush3.bf16.msra.mxu0 %v782_v44  ;;  %143 = vadd.xlane.f32.xlu0 %v122_v55  ;;  %v115_v44 = vunpack.c.l.bf16 %v788_v47  ;;  %v131_v55 = vmul.f32 %v99_v51, %v35_v53 }
  0x1c   :  { %524 = vmatprep.subr.bf16.mxu0 %v788_v47  ;;  %191 = vadd.xlane.f32.xlu1 %v170_v57 }
  0x1d   :  { %599 = vmatprep.subr.bf16.mxu1 %v645_v3  ;;  %v179_v57 = vmul.f32 %v115_v44, %v35_v53  ;;  %v402_v44 = vld [vmem:[%s932_s2] sm:$0xff] }
  0x1e   :  { %601 = vmatpush3.bf16.msra.mxu1 %v600_v26 }
  0x1f   :  { %525 = vmatpush3.bf16.msra.mxu0 %v806_v54  ;;  %145 = vadd.xlane.f32.xlu0 %v123_v0  ;;  %v52_v54 = vld [vmem:[%s930_s0 + $0xf8] sm:$0xff]  ;;  %v647_v0 = vmov 0.0  }
  0x20   :  { %193 = vadd.xlane.f32.xlu1 %v171_v2  ;;  %602 = vmatprep.subr.bf16.mxu1 %v645_v3  ;;  %v606_v62 = vpack.c.bf16 %v52_v54, %v51_v61 }
  0x21   :  { %581 = vmatprep.mubr.msk.f32.mxu1 %vm646_vm0, %v647_v0 }
  0x22   :  { %395 = vmatmul.mubr.bf16.vlgmr.msra.gmra.mrb[0].mxu0 %v264_v7  ;;  %604 = vmatpush3.bf16.msra.mxu1 %v603_v34 }
  0x23   :  { %147 = vadd.xlane.f32.xlu0 %v124_v11  ;;  %605 = vmatprep.subr.bf16.mxu1 %v645_v3  ;;  %v34_v3 = vld [vmem:[%s930_s0 + $0x68] sm:$0xff] }
  0x24   :  { %195 = vadd.xlane.f32.xlu1 %v172_v13  ;;  %v130_v50 = vmul.f32 %v98_v48, %v34_v3  ;;  %v178_v52 = vmul.f32 %v114_v49, %v34_v3 }
  0x26   :  { %607 = vmatpush3.bf16.msra.mxu1 %v606_v62 }
  0x27   :  { %149 = vadd.xlane.f32.xlu0 %v125_v19 }
  0x28   :  { %197 = vadd.xlane.f32.xlu1 %v173_v22 }
  0x2b   :  { %151 = vadd.xlane.f32.xlu0 %v126_v29 }
  0x2c   :  { %199 = vadd.xlane.f32.xlu1 %v174_v31 }
  0x2f   :  { %153 = vadd.xlane.f32.xlu0 %v127_v35 }
  0x30   :  { %201 = vadd.xlane.f32.xlu1 %v175_v38 }
  0x33   :  { %155 = vadd.xlane.f32.xlu0 %v128_v41 }
  0x34   :  { %203 = vadd.xlane.f32.xlu1 %v176_v43 }
  0x37   :  { %157 = vadd.xlane.f32.xlu0 %v129_v46 }
  0x38   :  { %205 = vadd.xlane.f32.xlu1 %v177_v28 }
  0x3b   :  { %159 = vadd.xlane.f32.xlu0 %v130_v50 }
  0x3c   :  { %207 = vadd.xlane.f32.xlu1 %v178_v52 }
  0x3f   :  { %161 = vadd.xlane.f32.xlu0 %v131_v55 }
  0x40   :  { %209 = vadd.xlane.f32.xlu1 %v179_v57 }
  0x43   :  { %163 = vadd.xlane.f32.xlu0 %v132_v59  ;;  %v408_v59 = vlaneseq }
  0x44   :  { %211 = vadd.xlane.f32.xlu1 %v180_v60 }
  0x45   :  { %v409_v61 = vshrl.u32 %v408_v59, 7 }
  0x47   :  { %v410_v62 = vsub.s32 1, %v409_v61 }
  0x94   :  { %v134_v47 = vpop.xlane.xlu0 %133 }
  0x95   :  { %v136_v1 = vpop.xlane.xlu1 %135 }
  0x98   :  { %v182_v2 = vpop.xlane.xlu0 %181 }
  0x99   :  { %v214_v4 = vsel %vm213_vm1, %v134_v47, %v182_v2  ;;  %v184_v5 = vpop.xlane.xlu1 %183  ;;  %v485_v2 = vsub.s32 0, %v409_v61 }
  0x9a   :  { %230 = vxpose.xlu0.b32.start [1/16] (narrow) %v214_v4, 8  ;;  %v215_v6 = vsel %vm213_vm1, %v136_v1, %v184_v5 }
  0x9c   :  { %v138_v7 = vpop.xlane.xlu0 %137 }
  0x9d   :  { %v186_v8 = vpop.xlane.xlu1 %185 }
  0x9e   :  { %231 = vxpose.xlu0.b32.cont [2/16] (narrow) %v215_v6, 8  ;;  %v216_v9 = vsel %vm213_vm1, %v138_v7, %v186_v8 }
  0xa0   :  { %v140_v11 = vpop.xlane.xlu0 %139 }
  0xa1   :  { %v188_v12 = vpop.xlane.xlu1 %187 }
  0xa2   :  { %232 = vxpose.xlu0.b32.cont [3/16] (narrow) %v216_v9, 8  ;;  %v217_v13 = vsel %vm213_vm1, %v140_v11, %v188_v12 }
  0xa4   :  { %v142_v14 = vpop.xlane.xlu0 %141 }
  0xa5   :  { %v190_v15 = vpop.xlane.xlu1 %189 }
  0xa6   :  { %233 = vxpose.xlu0.b32.cont [4/16] (narrow) %v217_v13, 8  ;;  %v218_v16 = vsel %vm213_vm1, %v142_v14, %v190_v15 }
  0xa8   :  { %v144_v17 = vpop.xlane.xlu0 %143 }
  0xa9   :  { %v192_v18 = vpop.xlane.xlu1 %191 }
  0xaa   :  { %234 = vxpose.xlu0.b32.cont [5/16] (narrow) %v218_v16, 8  ;;  %v219_v19 = vsel %vm213_vm1, %v144_v17, %v192_v18 }
  0xac   :  { %v146_v20 = vpop.xlane.xlu0 %145 }
  0xad   :  { %v194_v22 = vpop.xlane.xlu1 %193 }
  0xae   :  { %235 = vxpose.xlu0.b32.cont [6/16] (narrow) %v219_v19, 8  ;;  %v220_v23 = vsel %vm213_vm1, %v146_v20, %v194_v22 }
  0xb0   :  { %v148_v24 = vpop.xlane.xlu0 %147 }
  0xb1   :  { %v196_v26 = vpop.xlane.xlu1 %195 }
  0xb2   :  { %236 = vxpose.xlu0.b32.cont [7/16] (narrow) %v220_v23, 8  ;;  %v221_v27 = vsel %vm213_vm1, %v148_v24, %v196_v26 }
  0xb4   :  { %v150_v25 = vpop.xlane.xlu0 %149 }
  0xb5   :  { %v198_v29 = vpop.xlane.xlu1 %197 }
  0xb6   :  { %237 = vxpose.xlu0.b32.cont [8/16] (narrow) %v221_v27, 8  ;;  %v222_v30 = vsel %vm213_vm1, %v150_v25, %v198_v29 }
  0xb8   :  { %v152_v31 = vpop.xlane.xlu0 %151 }
  0xb9   :  { %v200_v21 = vpop.xlane.xlu1 %199 }
  0xba   :  { %238 = vxpose.xlu0.b32.cont [9/16] (narrow) %v222_v30, 8  ;;  %v223_v33 = vsel %vm213_vm1, %v152_v31, %v200_v21 }
  0xbc   :  { %v154_v34 = vpop.xlane.xlu0 %153 }
  0xbd   :  { %v202_v35 = vpop.xlane.xlu1 %201 }
  0xbe   :  { %239 = vxpose.xlu0.b32.cont [10/16] (narrow) %v223_v33, 8  ;;  %v224_v36 = vsel %vm213_vm1, %v154_v34, %v202_v35 }
  0xc0   :  { %v156_v38 = vpop.xlane.xlu0 %155 }
  0xc1   :  { %v204_v39 = vpop.xlane.xlu1 %203 }
  0xc2   :  { %240 = vxpose.xlu0.b32.cont [11/16] (narrow) %v224_v36, 8  ;;  %v225_v40 = vsel %vm213_vm1, %v156_v38, %v204_v39 }
  0xc4   :  { %v158_v41 = vpop.xlane.xlu0 %157 }
  0xc5   :  { %v206_v42 = vpop.xlane.xlu1 %205 }
  0xc6   :  { %241 = vxpose.xlu0.b32.cont [12/16] (narrow) %v225_v40, 8  ;;  %v226_v43 = vsel %vm213_vm1, %v158_v41, %v206_v42 }
  0xc8   :  { %v160_v32 = vpop.xlane.xlu0 %159 }
  0xc9   :  { %v208_v45 = vpop.xlane.xlu1 %207 }
  0xca   :  { %242 = vxpose.xlu0.b32.cont [13/16] (narrow) %v226_v43, 8  ;;  %v227_v46 = vsel %vm213_vm1, %v160_v32, %v208_v45 }
  0xcc   :  { %v162_v48 = vpop.xlane.xlu0 %161 }
  0xcd   :  { %v210_v28 = vpop.xlane.xlu1 %209 }
  0xce   :  { %243 = vxpose.xlu0.b32.cont [14/16] (narrow) %v227_v46, 8  ;;  %v228_v3 = vsel %vm213_vm1, %v162_v48, %v210_v28 }
  0xd0   :  { %v164_v49 = vpop.xlane.xlu0 %163 }
  0xd1   :  { %v212_v50 = vpop.xlane.xlu1 %211 }
  0xd2   :  { %244 = vxpose.xlu0.b32.cont [15/16] (narrow) %v228_v3, 8  ;;  %v229_v51 = vsel %vm213_vm1, %v164_v49, %v212_v50 }
  0xd6   :  { %245 = vxpose.xlu0.b32.end [16/16] (narrow) %v229_v51, 8 }
  0xf5   :  { %v526_v52 = vpop.f32.mrb[0].mxu0 }
  0xf6   :  { %v527_v53 = vpop.f32.mrb[1].mxu0 }
  0xf7   :  { %v528_v55 = vadd.f32 %v527_v53, %v526_v52  ;;  %v529_v56 = vpop.f32.mrb[2].mxu0 }
  0xf8   :  { %v530_v57 = vpop.f32.mrb[3].mxu0 }
  0xf9   :  { %v403_v37 = vsub.f32 %v402_v44, %v528_v55 }
  0xfb   :  { %582 = vmatmul.mubr.f32.vlgmr.msra.gmra.mrb[0].mxu1 %v403_v37 }
 0x11a   :  { %v246_v58 = vpop.trf.xlu0 }
 0x11b   :  { %643 = vrcp.f32 %v246_v58  ;;  %v411_v47 = vrot.slane %v246_v58, %v410_v62 }
 0x11d   :  { %v412_v4 = vmul.f32 %v411_v47, %v704_v10 }
 0x125   :  { %v644_v60 = vpop.eup %643 }
 0x126   :  { %v405_v54 = vmul.f32 %v644_v60, %v246_v58 }
 0x128   :  { %v406_v0 = vsub.f32 2.0, %v405_v54 }
 0x12a   :  { %v407_v1 = vmul.f32 %v644_v60, %v406_v0 }
 0x12c   :  { %v486_v7 = vrot.slane %v407_v1, %v485_v2 }
 0x1ce   :  { %v479_v5 = vpop.f32.mrb[0].mxu1 }
 0x1cf   :  { %v480_v6 = vadd.f32 %v479_v5, %v412_v4  ;;  %v583_v8 = vpop.f32.mrb[1].mxu1 }
 0x1d1   :  { %v487_v9 = vmul.f32 %v486_v7, %v480_v6 }
 0x1d3   :  { %v488_v11 = vadd.f32 %v487_v9, %v824_v63 }
 0x1d5   :  { %489 = vst [vmem:[%s933_s5] sm:$0xff] %v488_v11 }

</bundles_post_ra>
